<compile_context>
chip_gen: v7x
topology: tpu7x:2x2x1
jax: 0.10.0
libtpu: 0.0.40
codegen_flags: <defaults>
</compile_context>

<pallas_src>
import jax
import jax.numpy as jnp
from jax.experimental import pallas as pl
from jax.experimental.pallas import tpu as pltpu


def _mlp_kernel(xt_ref, w1_ref, b1_ref, w2_ref, b2_ref, o_ref):
    """Fused Linear->ReLU->Linear->Sigmoid for one batch tile, VPU/EUP only.

    xt_ref : (D, tm)  f32 VMEM  -- features on sublanes, batch tile on lanes
    w1_ref : (D, H)   f32 VMEM  -- fc1 weight (in_features x hidden)
    b1_ref : (H,)     f32 SMEM  -- fc1 bias
    w2_ref : (H,)     f32 SMEM  -- fc2 weight column (out_features == 1)
    b2_ref : (1,)     f32 SMEM  -- fc2 bias
    o_ref  : (1, tm)  f32 VMEM  -- lane-dense output row
    """
    xt = xt_ref[...]                     # (D, tm)
    w1 = w1_ref[...]                     # (D, H)
    hidden = w1.shape[1]                 # static (5)
    tm = xt.shape[1]                     # static tile width

    # Start the fc2 accumulator at the fc2 bias (scalar from SMEM).
    z = jnp.zeros((1, tm), jnp.float32) + b2_ref[0]

    # Static unroll over the 5 hidden units.  Each unit:
    #   VPU: lane-broadcast of the (D,1) weight column * (D,tm) inputs
    #   XLU: sublane reduce over D   -> (1, tm)
    #   VPU: + bias, ReLU, scale by fc2 weight, accumulate
    for j in range(hidden):
        hj = jnp.sum(w1[:, j:j + 1] * xt, axis=0, keepdims=True) + b1_ref[j]
        hj = jnp.maximum(hj, 0.0)                       # ReLU
        z = z + w2_ref[j] * hj                          # fc2 accumulate

    # Sigmoid: exp on the EUP, approximate reciprocal also on the EUP.
    o_ref[...] = pl.reciprocal(1.0 + jnp.exp(-z), approx=True).astype(o_ref.dtype)


def net_forward(x, w1, b1, w2, b2, *, tm_max=512):
    """Full 2-layer MLP.  x: (B, D) f32.  Returns (B, 1) f32."""
    B, D = x.shape
    H = w1.shape[1]
    assert w2.shape == (H, 1), "module fixes fc2 to Linear(hidden, 1)"
    out_dim = 1
    lane = 128

    # Lane-dense batch tiling: pad B up to a multiple of 128 (and of the tile).
    if B <= tm_max:
        tm = max(lane, ((B + lane - 1) // lane) * lane)
    else:
        tm = tm_max
    b_pad = ((B + tm - 1) // tm) * tm
    grid = (b_pad // tm,)

    # Present the batch on the lane axis: x^T padded to (D, b_pad).
    xt = jnp.zeros((D, b_pad), x.dtype).at[:, :B].set(x.T)

    out = pl.pallas_call(
        _mlp_kernel,
        out_shape=jax.ShapeDtypeStruct((1, b_pad), jnp.float32),
        grid=grid,
        in_specs=[
            # batch tile of the transposed input (double-buffered by Pallas)
            pl.BlockSpec((D, tm), lambda i: (0, i)),
            # fc1 weights stay resident across the whole grid
            pl.BlockSpec((D, H), lambda i: (0, 0)),
            # tiny vectors/scalars go to SMEM (scalar path, no VMEM tiles/DMA)
            pl.BlockSpec(memory_space=pltpu.MemorySpace.SMEM),   # b1 (H,)
            pl.BlockSpec(memory_space=pltpu.MemorySpace.SMEM),   # w2 (H,)
            pl.BlockSpec(memory_space=pltpu.MemorySpace.SMEM),   # b2 (1,)
        ],
        # Lane-dense output slab: last dim is the batch tile (multiple of 128).
        out_specs=pl.BlockSpec((1, tm), lambda i: (0, i)),
        compiler_params=pltpu.CompilerParams(
            # Batch axis is independent -> shard across v7x's 2 TensorCores.
            dimension_semantics=("parallel",),
        ),
    )(xt, w1, b1.reshape(H), w2.reshape(H), b2.reshape(1))

    # Strip padding and restore the torch-style (B, 1) shape.
    return out[0, :B].reshape(B, out_dim)


def init_params(key, in_features, hidden=5, out=1):
    """Deterministic init mimicking torch.nn.Linear default (U(+/- 1/sqrt(fan_in)))."""
    k1, k2, k3, k4 = jax.random.split(key, 4)
    lim1 = 1.0 / jnp.sqrt(in_features)
    lim2 = 1.0 / jnp.sqrt(hidden)
    w1 = jax.random.uniform(k1, (in_features, hidden), jnp.float32, -lim1, lim1)
    b1 = jax.random.uniform(k2, (hidden,), jnp.float32, -lim1, lim1)
    w2 = jax.random.uniform(k3, (hidden, out), jnp.float32, -lim2, lim2)
    b2 = jax.random.uniform(k4, (out,), jnp.float32, -lim2, lim2)
    return w1, b1, w2, b2


def reference_forward(x, w1, b1, w2, b2):
    h = jnp.maximum(x @ w1 + b1, 0.0)
    return jax.nn.sigmoid(h @ w2 + b2)


if __name__ == "__main__":
    key = jax.random.PRNGKey(0)
    kx, kp, kb = jax.random.split(key, 3)

    # 1) The module's native case: X_tensor is a single flattened row (1, D).
    B, D = 1, 16
    x = jax.random.normal(kx, (B, D), dtype=jnp.float32)
    w1, b1, w2, b2 = init_params(kp, D)

    out = jax.block_until_ready(net_forward(x, w1, b1, w2, b2))
    ref = reference_forward(x, w1, b1, w2, b2)
    assert out.shape == (B, 1)
    # approx reciprocal (EUP) is ~1e-4 relative; 2e-3 abs is ample for a sigmoid
    assert jnp.allclose(out, ref, atol=2e-3), (out, ref)

    # 2) Batched case exercising the grid / pipelined path (grid > 1).
    B2 = 1024
    x2 = jax.random.normal(kb, (B2, D), dtype=jnp.float32)
    out2 = jax.block_until_ready(net_forward(x2, w1, b1, w2, b2))
    ref2 = reference_forward(x2, w1, b1, w2, b2)
    assert out2.shape == (B2, 1)
    assert jnp.allclose(out2, ref2, atol=2e-3)

    print("KERNEL_OK")
</pallas_src>

<mosaic_0001>
module attributes {stable_mosaic.version = 11 : i64} {
  func.func @_mlp_kernel(%arg0: i32, %arg1: memref<16x128xf32, #tpu.memory_space<vmem>>, %arg2: memref<16x5xf32, #tpu.memory_space<vmem>>, %arg3: memref<5xf32, #tpu.memory_space<smem>>, %arg4: memref<5xf32, #tpu.memory_space<smem>>, %arg5: memref<1xf32, #tpu.memory_space<smem>>, %arg6: memref<1x128xf32, #tpu.memory_space<vmem>>) attributes {dimension_semantics = [#tpu.dimension_semantics<parallel>], iteration_bounds = array<i64: 1>, scalar_prefetch = 0 : i64, scratch_operands = 0 : i64, tpu.core_type = #tpu.core_type<tc>, window_params = [{transform_indices = @transform_0, window_bounds = array<i64: 16, 128>}, {pipeline_mode = #tpu.pipeline_mode<synchronous>, transform_indices = @transform_1, window_bounds = array<i64: 16, 5>}, {transform_indices = @transform_2, window_bounds = array<i64: 5>}, {transform_indices = @transform_3, window_bounds = array<i64: 5>}, {transform_indices = @transform_4, window_bounds = array<i64: 1>}, {transform_indices = @transform_5, window_bounds = array<i64: 1, 128>}]} {
    %c0 = arith.constant 0 : index
    %c0_0 = arith.constant 0 : index
    %0 = vector.load %arg1[%c0, %c0_0] : memref<16x128xf32, #tpu.memory_space<vmem>>, vector<16x128xf32>
    %c0_1 = arith.constant 0 : index
    %c0_2 = arith.constant 0 : index
    %1 = vector.load %arg2[%c0_1, %c0_2] : memref<16x5xf32, #tpu.memory_space<vmem>>, vector<16x5xf32>
    %cst = arith.constant 0.000000e+00 : f32
    %2 = vector.broadcast %cst : f32 to vector<1x128xf32>
    %c0_3 = arith.constant 0 : index
    %3 = memref.load %arg5[%c0_3] : memref<1xf32, #tpu.memory_space<smem>>
    %4 = vector.broadcast %3 : f32 to vector<1x128xf32>
    %5 = arith.addf %2, %4 : vector<1x128xf32>
    %6 = vector.extract_strided_slice %1 {offsets = [0, 0], sizes = [16, 1], strides = [1, 1]} : vector<16x5xf32> to vector<16x1xf32>
    %7 = vector.broadcast %6 : vector<16x1xf32> to vector<16x128xf32>
    %8 = arith.mulf %7, %0 : vector<16x128xf32>
    %cst_4 = arith.constant dense<0.000000e+00> : vector<128xf32>
    %9 = vector.multi_reduction <add>, %8, %cst_4 [0] : vector<16x128xf32> to vector<128xf32>
    %10 = vector.shape_cast %9 : vector<128xf32> to vector<1x128xf32>
    %c0_5 = arith.constant 0 : index
    %11 = memref.load %arg3[%c0_5] : memref<5xf32, #tpu.memory_space<smem>>
    %12 = vector.broadcast %11 : f32 to vector<1x128xf32>
    %13 = arith.addf %10, %12 : vector<1x128xf32>
    %cst_6 = arith.constant 0.000000e+00 : f32
    %14 = vector.broadcast %cst_6 : f32 to vector<1x128xf32>
    %15 = arith.maximumf %13, %14 : vector<1x128xf32>
    %c0_7 = arith.constant 0 : index
    %16 = memref.load %arg4[%c0_7] : memref<5xf32, #tpu.memory_space<smem>>
    %17 = vector.broadcast %16 : f32 to vector<1x128xf32>
    %18 = arith.mulf %17, %15 : vector<1x128xf32>
    %19 = arith.addf %5, %18 : vector<1x128xf32>
    %20 = vector.extract_strided_slice %1 {offsets = [0, 1], sizes = [16, 1], strides = [1, 1]} : vector<16x5xf32> to vector<16x1xf32>
    %21 = vector.broadcast %20 : vector<16x1xf32> to vector<16x128xf32>
    %22 = arith.mulf %21, %0 : vector<16x128xf32>
    %cst_8 = arith.constant dense<0.000000e+00> : vector<128xf32>
    %23 = vector.multi_reduction <add>, %22, %cst_8 [0] : vector<16x128xf32> to vector<128xf32>
    %24 = vector.shape_cast %23 : vector<128xf32> to vector<1x128xf32>
    %c1 = arith.constant 1 : index
    %25 = memref.load %arg3[%c1] : memref<5xf32, #tpu.memory_space<smem>>
    %26 = vector.broadcast %25 : f32 to vector<1x128xf32>
    %27 = arith.addf %24, %26 : vector<1x128xf32>
    %cst_9 = arith.constant 0.000000e+00 : f32
    %28 = vector.broadcast %cst_9 : f32 to vector<1x128xf32>
    %29 = arith.maximumf %27, %28 : vector<1x128xf32>
    %c1_10 = arith.constant 1 : index
    %30 = memref.load %arg4[%c1_10] : memref<5xf32, #tpu.memory_space<smem>>
    %31 = vector.broadcast %30 : f32 to vector<1x128xf32>
    %32 = arith.mulf %31, %29 : vector<1x128xf32>
    %33 = arith.addf %19, %32 : vector<1x128xf32>
    %34 = vector.extract_strided_slice %1 {offsets = [0, 2], sizes = [16, 1], strides = [1, 1]} : vector<16x5xf32> to vector<16x1xf32>
    %35 = vector.broadcast %34 : vector<16x1xf32> to vector<16x128xf32>
    %36 = arith.mulf %35, %0 : vector<16x128xf32>
    %cst_11 = arith.constant dense<0.000000e+00> : vector<128xf32>
    %37 = vector.multi_reduction <add>, %36, %cst_11 [0] : vector<16x128xf32> to vector<128xf32>
    %38 = vector.shape_cast %37 : vector<128xf32> to vector<1x128xf32>
    %c2 = arith.constant 2 : index
    %39 = memref.load %arg3[%c2] : memref<5xf32, #tpu.memory_space<smem>>
    %40 = vector.broadcast %39 : f32 to vector<1x128xf32>
    %41 = arith.addf %38, %40 : vector<1x128xf32>
    %cst_12 = arith.constant 0.000000e+00 : f32
    %42 = vector.broadcast %cst_12 : f32 to vector<1x128xf32>
    %43 = arith.maximumf %41, %42 : vector<1x128xf32>
    %c2_13 = arith.constant 2 : index
    %44 = memref.load %arg4[%c2_13] : memref<5xf32, #tpu.memory_space<smem>>
    %45 = vector.broadcast %44 : f32 to vector<1x128xf32>
    %46 = arith.mulf %45, %43 : vector<1x128xf32>
    %47 = arith.addf %33, %46 : vector<1x128xf32>
    %48 = vector.extract_strided_slice %1 {offsets = [0, 3], sizes = [16, 1], strides = [1, 1]} : vector<16x5xf32> to vector<16x1xf32>
    %49 = vector.broadcast %48 : vector<16x1xf32> to vector<16x128xf32>
    %50 = arith.mulf %49, %0 : vector<16x128xf32>
    %cst_14 = arith.constant dense<0.000000e+00> : vector<128xf32>
    %51 = vector.multi_reduction <add>, %50, %cst_14 [0] : vector<16x128xf32> to vector<128xf32>
    %52 = vector.shape_cast %51 : vector<128xf32> to vector<1x128xf32>
    %c3 = arith.constant 3 : index
    %53 = memref.load %arg3[%c3] : memref<5xf32, #tpu.memory_space<smem>>
    %54 = vector.broadcast %53 : f32 to vector<1x128xf32>
    %55 = arith.addf %52, %54 : vector<1x128xf32>
    %cst_15 = arith.constant 0.000000e+00 : f32
    %56 = vector.broadcast %cst_15 : f32 to vector<1x128xf32>
    %57 = arith.maximumf %55, %56 : vector<1x128xf32>
    %c3_16 = arith.constant 3 : index
    %58 = memref.load %arg4[%c3_16] : memref<5xf32, #tpu.memory_space<smem>>
    %59 = vector.broadcast %58 : f32 to vector<1x128xf32>
    %60 = arith.mulf %59, %57 : vector<1x128xf32>
    %61 = arith.addf %47, %60 : vector<1x128xf32>
    %62 = vector.extract_strided_slice %1 {offsets = [0, 4], sizes = [16, 1], strides = [1, 1]} : vector<16x5xf32> to vector<16x1xf32>
    %63 = vector.broadcast %62 : vector<16x1xf32> to vector<16x128xf32>
    %64 = arith.mulf %63, %0 : vector<16x128xf32>
    %cst_17 = arith.constant dense<0.000000e+00> : vector<128xf32>
    %65 = vector.multi_reduction <add>, %64, %cst_17 [0] : vector<16x128xf32> to vector<128xf32>
    %66 = vector.shape_cast %65 : vector<128xf32> to vector<1x128xf32>
    %c4 = arith.constant 4 : index
    %67 = memref.load %arg3[%c4] : memref<5xf32, #tpu.memory_space<smem>>
    %68 = vector.broadcast %67 : f32 to vector<1x128xf32>
    %69 = arith.addf %66, %68 : vector<1x128xf32>
    %cst_18 = arith.constant 0.000000e+00 : f32
    %70 = vector.broadcast %cst_18 : f32 to vector<1x128xf32>
    %71 = arith.maximumf %69, %70 : vector<1x128xf32>
    %c4_19 = arith.constant 4 : index
    %72 = memref.load %arg4[%c4_19] : memref<5xf32, #tpu.memory_space<smem>>
    %73 = vector.broadcast %72 : f32 to vector<1x128xf32>
    %74 = arith.mulf %73, %71 : vector<1x128xf32>
    %75 = arith.addf %61, %74 : vector<1x128xf32>
    %cst_20 = arith.constant 0.000000e+00 : f32
    %76 = vector.broadcast %cst_20 : f32 to vector<1x128xf32>
    %77 = arith.subf %76, %75 : vector<1x128xf32>
    %78 = math.exp %77 : vector<1x128xf32>
    %cst_21 = arith.constant 1.000000e+00 : f32
    %79 = vector.broadcast %cst_21 : f32 to vector<1x128xf32>
    %80 = arith.addf %79, %78 : vector<1x128xf32>
    %81 = tpu.reciprocal %80 {approx = true} : vector<1x128xf32> -> vector<1x128xf32>
    %c0_22 = arith.constant 0 : index
    %c0_23 = arith.constant 0 : index
    %82 = vector.load %arg6[%c0_22, %c0_23] : memref<1x128xf32, #tpu.memory_space<vmem>>, vector<1x128xf32>
    tpu.vector_store %arg6[%c0_22, %c0_23], %81 {strides = array<i32>} : memref<1x128xf32, #tpu.memory_space<vmem>>, vector<1x128xf32>,
    return
  }
  func.func @transform_0(%arg0: i32) -> (i32, i32) {
    %c0_i32 = arith.constant 0 : i32
    %c0_i32_0 = arith.constant 0 : i32
    return %c0_i32, %arg0 : i32, i32
  }
  func.func @transform_1(%arg0: i32) -> (i32, i32) {
    %c0_i32 = arith.constant 0 : i32
    %c0_i32_0 = arith.constant 0 : i32
    %c0_i32_1 = arith.constant 0 : i32
    return %c0_i32, %c0_i32_0 : i32, i32
  }
  func.func @transform_2(%arg0: i32) -> i32 {
    %c0_i32 = arith.constant 0 : i32
    %c0_i32_0 = arith.constant 0 : i32
    return %c0_i32 : i32
  }
  func.func @transform_3(%arg0: i32) -> i32 {
    %c0_i32 = arith.constant 0 : i32
    %c0_i32_0 = arith.constant 0 : i32
    return %c0_i32 : i32
  }
  func.func @transform_4(%arg0: i32) -> i32 {
    %c0_i32 = arith.constant 0 : i32
    %c0_i32_0 = arith.constant 0 : i32
    return %c0_i32 : i32
  }
  func.func @transform_5(%arg0: i32) -> (i32, i32) {
    %c0_i32 = arith.constant 0 : i32
    %c0_i32_0 = arith.constant 0 : i32
    return %c0_i32, %arg0 : i32, i32
  }
}

</mosaic_0001>

<bundles_post_ra>
// kernel: tpu_custom_call.1
= control target key start
LH: loop header
LB: loop body
LE: loop exit
PB: predicated region body
PF: predicated region fallthrough
CT: control target
= control target key end

     0   :  { %11 = vsyncpa [#allocation5], 0  ;;  %s363_s0 = inlined_call_operand.vmem [shape: f32[16,128], index: 0, kind: input, shape index: {}]   ;;  %s364_s1 = inlined_call_operand.vmem [shape: f32[16,5], index: 1, kind: input, shape index: {}]   ;;  %s365_s2 = inlined_call_operand.vmem [shape: f32[5], index: 2, kind: input, shape index: {}]   ;;  %s366_s3 = inlined_call_operand.vmem [shape: f32[5], index: 3, kind: input, shape index: {}]   ;;  %s367_s4 = inlined_call_operand.<no memory space> [shape: f32[1], index: 4, kind: input, shape index: {}]   ;;  %s368_s5 = inlined_call_operand.hbm [shape: f32[1,128], index: 5, kind: output, shape index: {}]  }
   0x1   :  { %12 = vsyncpa [#allocation7], 0 }
   0x2   :  { %13 = vsyncpa [#allocation4], 0  ;;  %s24_s20 = sshll.u32 %s365_s2, 4  ;;  %s34_s23 = sshll.u32 %s366_s3, 4  ;;  %s25_s20 = int_to_ptr.vmem [resolvable:$true] %s24_s20  ;;  %s35_s23 = int_to_ptr.vmem [resolvable:$true] %s34_s23 }
   0x3   :  { %s231_s24 = scalar_lea.vmem %s25_s20, 16  ;;  %p236_p1 = scmp.lt.s32.totalorder %s25_s20, %s25_s20 }
   0x4   :  { %p232_p0 = scmp.ne.s32.totalorder %s25_s20, %s231_s24  ;;  %p237_p2 = scmp.lt.s32.totalorder %s231_s24, %s231_s24 }
   0x6   :  { %p238_p3 = por %p237_p2, %p236_p1 }
   0x8   :  { %p239_p4 = pnand %p238_p3, %p232_p0 }
   0xa   :  { %242 = shalt.err (!%p239_p4)
}
   0xb   :  { %s283_s25 = smov [#allocation3]   ;;  %s243_s26 = scalar_lea.vmem %s35_s23, 16 }
   0xc   :  { %27 = dma.vmem_to_smem %s25_s20, 16, %s283_s25, [#allocation5]  }
   0xd   :  { %p244_p5 = scmp.ne.s32.totalorder %s35_s23, %s243_s26  ;;  %p248_p6 = scmp.lt.s32.totalorder %s35_s23, %s35_s23 }
   0xe   :  { %p249_p7 = scmp.lt.s32.totalorder %s243_s26, %s243_s26 }
  0x10   :  { %p250_p8 = por %p249_p7, %p248_p6 }
  0x12   :  { %p251_p9 = pnand %p250_p8, %p244_p5 }
  0x14   :  { %254 = shalt.err (!%p251_p9)
}
  0x15   :  { %s284_s2 = smov [#allocation6]  }
  0x16   :  { %37 = dma.vmem_to_smem %s35_s23, 16, %s284_s2, [#allocation7]  }
  0x17   :  { %277 = dma.done.wait [#allocation5], 16  }
  0x18   :  { %278 = vsyncadd [#allocation5], 4294967280 }
  0x19   :  { %279 = dma.done.wait [#allocation7], 16  }
  0x1a   :  { %280 = vsyncadd [#allocation7], 4294967280 }
  0x1b   :  { %46 = sfence }
  0x1c   :  { %v49_v0 = vld [vmem:[%s364_s1] sm:$0xff]  ;;  %v285_v1 = vmov 1   ;;  %v286_v2 = vmov 0   ;;  %v50_v3 = vld [vmem:[%s364_s1 + $0x8] sm:$0xff]  ;;  %v287_v4 = vmov 2   ;;  %v288_v5 = vmov 3  }
  0x1d   :  { %220 = vset.pattern.permute.xlu1 %v285_v1  ;;  %219 = vset.pattern.permute.xlu0 %v286_v2  ;;  %v289_v6 = vmov 4   ;;  %v47_v9 = vld [vmem:[%s363_s0] sm:$0xff]  ;;  %v48_v10 = vld [vmem:[%s363_s0 + $0x8] sm:$0xff]  ;;  %s73_s8 = sld [smem:[#allocation3]]  ;;  %s339_s0 = sld [smem:[#allocation3 + $0x1]] }
  0x1e   :  { %82 = vperm.xlu1 %220, %v49_v0   ;;  %56 = vperm.xlu0 %219, %v49_v0   ;;  %s341_s9 = sld [smem:[#allocation6]]  ;;  %s343_s10 = sld [smem:[#allocation3 + $0x2]] }
  0x1f   :  { %s207_s11 = sld [smem:[#allocation3 + $0x3]]  ;;  %s204_s12 = sld [smem:[#allocation6 + $0x1]] }
  0x20   :  { %s206_s13 = sld [smem:[#allocation6 + $0x2]]  ;;  %s209_s14 = sld [smem:[#allocation3 + $0x4]] }
  0x21   :  { %s208_s15 = sld [smem:[#allocation6 + $0x3]]  ;;  %s210_s18 = sld [smem:[#allocation6 + $0x4]] }
  0x22   :  { %86 = vperm.xlu1 %220, %v50_v3   ;;  %61 = vperm.xlu0 %219, %v50_v3  }
  0x23   :  { %v74_v41 = vstv %s73_s8  ;;  %v99_v55 = vstv %s339_s0 }
  0x24   :  { %v78_v60 = vstv %s341_s9  ;;  %v124_v61 = vstv %s343_s10 }
  0x25   :  { %v149_v1 = vstv %s207_s11 }
  0x26   :  { %222 = vset.pattern.permute.xlu1 %v287_v4  ;;  %221 = vset.pattern.permute.xlu0 %v287_v4 }
  0x27   :  { %111 = vperm.xlu1 %222, %v50_v3   ;;  %107 = vperm.xlu0 %221, %v49_v0  }
  0x2b   :  { %223 = vset.pattern.permute.xlu1 %v288_v5  ;;  %224 = vset.pattern.permute.xlu0 %v288_v5 }
  0x2c   :  { %132 = vperm.xlu1 %223, %v49_v0   ;;  %136 = vperm.xlu0 %224, %v50_v3  }
  0x30   :  { %225 = vset.pattern.permute.xlu1 %v289_v6  ;;  %226 = vset.pattern.permute.xlu0 %v289_v6  ;;  %v52_v6 = vstv %s367_s4  ;;  %s290_s4 = smov [#allocation8]  }
  0x31   :  { %157 = vperm.xlu1 %225, %v49_v0   ;;  %s193_s19 = sshll.u32 %s290_s4, 4  ;;  %s194_s19 = int_to_ptr.vmem [resolvable:$true] %s193_s19 }
  0x32   :  { %s255_s20 = scalar_lea.vmem %s194_s19, 16  ;;  %s259_s21 = scalar_lea.vmem %s194_s19, 32 }
  0x33   :  { %p256_p10 = scmp.ne.s32.totalorder %s194_s19, %s255_s20  ;;  %p260_p11 = scmp.lt.s32.totalorder %s194_s19, %s194_s19 }
  0x34   :  { %p261_p12 = scmp.lt.s32.totalorder %s259_s21, %s255_s20 }
  0x35   :  { %161 = vperm.xlu1 %225, %v50_v3  }
  0x36   :  { %p262_p13 = por %p261_p12, %p260_p11 }
  0x38   :  { %p263_p0 = pnand %p262_p13, %p256_p10 }
  0x9d   :  { %v83_v7 = vpop.permute.xlu1 %82  ;;  %v57_v8 = vpop.permute.xlu0 %56 }
  0x9e   :  { %v64_v11 = vmul.f32 %v57_v8, %v47_v9  ;;  %v89_v14 = vmul.f32 %v83_v7, %v47_v9 }
  0xa1   :  { %v87_v12 = vpop.permute.xlu1 %86  ;;  %v62_v13 = vpop.permute.xlu0 %61 }
  0xa2   :  { %v90_v15 = vmul.f32 %v87_v12, %v48_v10  ;;  %v65_v16 = vmul.f32 %v62_v13, %v48_v10 }
  0xa4   :  { %v91_v17 = vadd.f32 %v90_v15, %v89_v14  ;;  %v66_v18 = vadd.f32 %v65_v16, %v64_v11  ;;  %v128_v14 = vstv %s206_s13 }
  0xa6   :  { %v92_v19 = vrot.slane %v91_v17, 4  ;;  %v67_v20 = vrot.slane %v66_v18, 4  ;;  %v112_v21 = vpop.permute.xlu1 %111  ;;  %v108_v22 = vpop.permute.xlu0 %107 }
  0xa7   :  { %v115_v23 = vmul.f32 %v112_v21, %v48_v10  ;;  %v114_v24 = vmul.f32 %v108_v22, %v47_v9 }
  0xa8   :  { %v93_v25 = vadd.f32 %v92_v19, %v91_v17  ;;  %v68_v26 = vadd.f32 %v67_v20, %v66_v18  ;;  %v174_v18 = vstv %s209_s14  ;;  %v153_v19 = vstv %s208_s15 }
  0xa9   :  { %v116_v27 = vadd.f32 %v115_v23, %v114_v24 }
  0xaa   :  { %v94_v28 = vrot.slane %v93_v25, 2  ;;  %v69_v29 = vrot.slane %v68_v26, 2 }
  0xab   :  { %v117_v30 = vrot.slane %v116_v27, 4  ;;  %v133_v31 = vpop.permute.xlu1 %132  ;;  %v137_v32 = vpop.permute.xlu0 %136 }
  0xac   :  { %v70_v33 = vadd.f32 %v69_v29, %v68_v26  ;;  %v139_v34 = vmul.f32 %v133_v31, %v47_v9  ;;  %v140_v35 = vmul.f32 %v137_v32, %v48_v10  ;;  %v95_v36 = vadd.f32 %v94_v28, %v93_v25 }
  0xad   :  { %v118_v37 = vadd.f32 %v117_v30, %v116_v27  ;;  %v178_v25 = vstv %s210_s18 }
  0xae   :  { %v71_v38 = vrot.slane %v70_v33, 1  ;;  %v141_v39 = vadd.f32 %v140_v35, %v139_v34  ;;  %v96_v45 = vrot.slane %v95_v36, 1 }
  0xaf   :  { %v119_v40 = vrot.slane %v118_v37, 2 }
  0xb0   :  { %v72_v42 = vadd.f32 %v71_v38, %v70_v33  ;;  %v142_v43 = vrot.slane %v141_v39, 4  ;;  %v158_v44 = vpop.permute.xlu1 %157  ;;  %v97_v52 = vadd.f32 %v96_v45, %v95_v36 }
  0xb1   :  { %v120_v46 = vadd.f32 %v119_v40, %v118_v37  ;;  %v164_v53 = vmul.f32 %v158_v44, %v47_v9 }
  0xb2   :  { %v143_v47 = vadd.f32 %v142_v43, %v141_v39  ;;  %v75_v48 = vadd.f32 %v74_v41, %v72_v42  ;;  %v100_v63 = vadd.f32 %v99_v55, %v97_v52 }
  0xb3   :  { %v121_v49 = vrot.slane %v120_v46, 1 }
  0xb4   :  { %v144_v50 = vrot.slane %v143_v47, 2  ;;  %v162_v51 = vpop.permute.xlu1 %161  ;;  %v76_v57 = vmax.f32 %v75_v48, 0.0  ;;  %v101_v7 = vmax.f32 %v100_v63, 0.0 }
  0xb5   :  { %v165_v54 = vmul.f32 %v162_v51, %v48_v10  ;;  %v122_v58 = vadd.f32 %v121_v49, %v120_v46  ;;  %v103_v10 = vstv %s204_s12 }
  0xb6   :  { %v145_v56 = vadd.f32 %v144_v50, %v143_v47  ;;  %v79_v3 = vmul.f32 %v78_v60, %v76_v57  ;;  %v104_v15 = vmul.f32 %v103_v10, %v101_v7 }
  0xb7   :  { %v166_v59 = vadd.f32 %v165_v54, %v164_v53  ;;  %v125_v4 = vadd.f32 %v124_v61, %v122_v58 }
  0xb8   :  { %v146_v62 = vrot.slane %v145_v56, 1  ;;  %v80_v11 = vadd.f32 %v79_v3, %v52_v6 }
  0xb9   :  { %v167_v0 = vrot.slane %v166_v59, 4  ;;  %v126_v12 = vmax.f32 %v125_v4, 0.0 }
  0xba   :  { %v147_v2 = vadd.f32 %v146_v62, %v145_v56  ;;  %v105_v22 = vadd.f32 %v104_v15, %v80_v11 }
  0xbb   :  { %v168_v5 = vadd.f32 %v167_v0, %v166_v59  ;;  %v129_v20 = vmul.f32 %v128_v14, %v126_v12 }
  0xbc   :  { %v150_v8 = vadd.f32 %v149_v1, %v147_v2 }
  0xbd   :  { %v169_v9 = vrot.slane %v168_v5, 2  ;;  %v130_v27 = vadd.f32 %v129_v20, %v105_v22 }
  0xbe   :  { %v151_v16 = vmax.f32 %v150_v8, 0.0 }
  0xbf   :  { %v170_v13 = vadd.f32 %v169_v9, %v168_v5 }
  0xc0   :  { %v154_v24 = vmul.f32 %v153_v19, %v151_v16 }
  0xc1   :  { %v171_v17 = vrot.slane %v170_v13, 1 }
  0xc2   :  { %v155_v28 = vadd.f32 %v154_v24, %v130_v27 }
  0xc3   :  { %v172_v21 = vadd.f32 %v171_v17, %v170_v13 }
  0xc5   :  { %v175_v23 = vadd.f32 %v174_v18, %v172_v21 }
  0xc7   :  { %v176_v26 = vmax.f32 %v175_v23, 0.0 }
  0xc9   :  { %v179_v29 = vmul.f32 %v178_v25, %v176_v26 }
  0xcb   :  { %v180_v30 = vadd.f32 %v179_v29, %v155_v28 }
  0xcd   :  { %v181_v31 = vsub.f32 0.0, %v180_v30 }
  0xcf   :  { %v182_v32 = vmul.f32 1.442695, %v181_v31 }
  0xd1   :  { %227 = vpow2.f32 %v182_v32 }
  0xdb   :  { %v228_v33 = vpop.eup %227 }
  0xdc   :  { %v184_v34 = vadd.f32 1.0, %v228_v33 }
  0xde   :  { %229 = vrcp.f32 %v184_v34 }
  0xe8   :  { %v230_v35 = vpop.eup %229 }
  0xe9   :  { %186 = vst [vmem:[#allocation8] sm:$0x1] %v230_v35 }
  0xea   :  { %266 = shalt.err (!%p263_p0)
}
  0xeb   :  { %s267_s24 = scalar_lea.hbm %s368_s5, 16 }
  0xec   :  { %p268_p1 = scmp.ne.s32.totalorder %s368_s5, %s267_s24  ;;  %p271_p2 = scmp.lt.u32.totalorder %s267_s24, %s368_s5 }
  0xee   :  { %p273_p3 = pnand %p271_p2, %p268_p1 }
  0xf0   :  { %276 = shalt.err (!%p273_p3)
}
  0xf1   :  { %196 = dma.vmem_to_hbm [thread:$0]  %s194_s19, 16, %s368_s5, [#allocation4]  }
  0xf2   :  { %281 = dma.done.wait [#allocation4], 16  }
  0xf3   :  { %282 = vsyncadd [#allocation4], 4294967280 }
  0xf4   :  { %200 = vsyncpa [#allocation4], 1 }
  0xf5   :  { %201 = vsyncpa [#allocation5], 1 }
  0xf6   :  { %202 = vsyncpa [#allocation7], 1 }

</bundles_post_ra>
